<compile_context>
chip_gen: v6e
topology: v6e:2x2x1
jax: 0.10.0
libtpu: 0.0.40
codegen_flags: <defaults>
</compile_context>

<pallas_src>
import functools

import jax
import jax.numpy as jnp
from jax.experimental import pallas as pl
from jax.experimental.pallas import tpu as pltpu


def _mergenet_kernel(x_ref, w1_ref, b1_ref, w2_ref, b2_ref, w3_ref, b3_ref, o_ref):
    # x_ref: (max_c, td)   w1: (h, max_c)   w2: (h, h)   w3: (1, h)
    # b1/b2: (h, 1) columns (broadcast along lanes),  b3: SMEM scalar (1,)
    x = x_ref[...]
    h1 = jnp.dot(w1_ref[...], x, preferred_element_type=jnp.float32) + b1_ref[...]
    h1 = jnp.maximum(h1, 0.0)
    # TODO(synk): nn.Dropout(p=0.2) is identity at inference; training-mode dropout not implemented.
    h2 = jnp.dot(w2_ref[...], h1, preferred_element_type=jnp.float32) + b2_ref[...]
    h2 = jnp.maximum(h2, 0.0)
    out = jnp.dot(w3_ref[...], h2, preferred_element_type=jnp.float32) + b3_ref[0]
    o_ref[...] = out.astype(o_ref.dtype)


def _pick_lane_tile(d_pad):
    """Pick the lane tile for a (possibly padded) lane extent d_pad.

    - d_pad <= 512: single full-width step (small inputs, e.g. the demo).
    - otherwise d_pad is a multiple of 512; pick the largest 512-multiple
      tile <= 8192 that divides d_pad while keeping >= 2 grid steps
      (v7x dual-TC sharding).  Big tiles amortize the ~0.35us/step overhead.
    """
    if d_pad <= 512:
        return d_pad
    m = d_pad // 512               # number of 512-lane chunks
    best_t = 1
    t_max = min(16, m // 2)        # td <= 8192 and grid >= 2
    for t in range(1, t_max + 1):
        if m % t == 0:
            best_t = t
    return 512 * best_t


@functools.partial(jax.jit, static_argnames=("x_bf16",))
def mergenet_forward(x, w1, b1, w2, b2, w3, b3, x_bf16=False):
    """x: (max_c, d) f32; weights torch-layout (out, in); returns (1, d) f32.

    x_bf16=True casts the (only large) x operand to bfloat16 to halve HBM
    traffic; accumulation stays f32.  Off by default (slight numeric change).
    """
    max_c, d = x.shape
    hidden = w1.shape[0]

    # Pad the lane axis up to a multiple of 512 when d is large / ragged so the
    # tile stays 256-lane MXU aligned (v6e/v7x) and the grid is well formed.
    if d > 512 and d % 512 != 0:
        d_pad = ((d + 511) // 512) * 512
        x_in = jnp.pad(x, ((0, 0), (0, d_pad - d)))
    else:
        d_pad = d
        x_in = x
    td = _pick_lane_tile(d_pad)

    if x_bf16:
        x_in = x_in.astype(jnp.bfloat16)

    flops = 2 * d_pad * (max_c * hidden + hidden * hidden + hidden)
    bytes_accessed = (x_in.size * x_in.dtype.itemsize
                      + 4 * (w1.size + b1.size + w2.size + b2.size
                             + w3.size + b3.size + d_pad))

    out = pl.pallas_call(
        _mergenet_kernel,
        out_shape=jax.ShapeDtypeStruct((1, d_pad), jnp.float32),
        grid_spec=pl.GridSpec(
            grid=(d_pad // td,),
            in_specs=[
                pl.BlockSpec((max_c, td), lambda i: (0, i)),        # x tile (lanes = d)
                pl.BlockSpec((hidden, max_c), lambda i: (0, 0)),    # W1 (full)
                pl.BlockSpec((hidden, 1), lambda i: (0, 0)),        # b1 column
                pl.BlockSpec((hidden, hidden), lambda i: (0, 0)),   # W2 (full)
                pl.BlockSpec((hidden, 1), lambda i: (0, 0)),        # b2 column
                pl.BlockSpec((1, hidden), lambda i: (0, 0)),        # W3 (full)
                pl.BlockSpec(memory_space=pltpu.MemorySpace.SMEM),  # b3 scalar
            ],
            out_specs=pl.BlockSpec((1, td), lambda i: (0, i)),      # lane-dense store
        ),
        compiler_params=pltpu.CompilerParams(
            dimension_semantics=("parallel",),
        ),
        cost_estimate=pl.CostEstimate(
            flops=flops, transcendentals=0, bytes_accessed=bytes_accessed),
    )(x_in, w1, b1, w2, b2, w3, b3)

    if d_pad != d:
        out = out[:, :d]
    return out  # (1, d) -- already in the torch output layout, no transpose


def _init_linear(key, fan_in, fan_out):
    """Deterministic init mimicking torch.nn.Linear (uniform +-1/sqrt(fan_in)).

    Weights stored torch-style as (out, in); biases as (out, 1) columns.
    """
    kw, kb = jax.random.split(key)
    bound = 1.0 / jnp.sqrt(jnp.float32(fan_in))
    w = jax.random.uniform(kw, (fan_out, fan_in), jnp.float32, -bound, bound)
    b = jax.random.uniform(kb, (fan_out, 1), jnp.float32, -bound, bound)
    return w, b


def _reference(x, w1, b1, w2, b2, w3, b3):
    """Pure-JAX replica of the torch forward (inference)."""
    xt = x.T                                            # (d, max_c)
    h1 = jnp.maximum(xt @ w1.T + b1.reshape(1, -1), 0.0)
    h2 = jnp.maximum(h1 @ w2.T + b2.reshape(1, -1), 0.0)
    return (h2 @ w3.T + b3.reshape(1, -1)).T            # (1, d)


if __name__ == "__main__":
    max_c = 8       # k: number of candidate boxes fed to the merge net
    hidden_c = 16

    key = jax.random.PRNGKey(0)
    kx, k1, k2, k3, kx2 = jax.random.split(key, 5)

    w1, b1 = _init_linear(k1, max_c, hidden_c)
    w2, b2 = _init_linear(k2, hidden_c, hidden_c)
    w3, b3_col = _init_linear(k3, hidden_c, 1)
    b3 = b3_col.reshape((1,))   # SMEM scalar operand

    # --- small demo shape (single full-width step) ---
    d = 128
    x = jax.random.normal(kx, (max_c, d), jnp.float32)
    y = jax.block_until_ready(mergenet_forward(x, w1, b1, w2, b2, w3, b3))
    y_ref = _reference(x, w1, b1, w2, b2, w3, b3)
    assert y.shape == (1, d), y.shape
    assert jnp.allclose(y, y_ref, atol=1e-5, rtol=1e-5), "mismatch vs reference (d=128)"

    # --- ragged / multi-step shape (exercises padding + tiled 'parallel' grid) ---
    d2 = 1100
    x2 = jax.random.normal(kx2, (max_c, d2), jnp.float32)
    y2 = jax.block_until_ready(mergenet_forward(x2, w1, b1, w2, b2, w3, b3))
    y2_ref = _reference(x2, w1, b1, w2, b2, w3, b3)
    assert y2.shape == (1, d2), y2.shape
    assert jnp.allclose(y2, y2_ref, atol=1e-5, rtol=1e-5), "mismatch vs reference (d=1100)"

    print("KERNEL_OK")
</pallas_src>

<mosaic_0001>
module attributes {stable_mosaic.version = 11 : i64} {
  func.func @_mergenet_kernel(%arg0: i32, %arg1: memref<8x128xf32, #tpu.memory_space<vmem>>, %arg2: memref<16x8xf32, #tpu.memory_space<vmem>>, %arg3: memref<16x1xf32, #tpu.memory_space<vmem>>, %arg4: memref<16x16xf32, #tpu.memory_space<vmem>>, %arg5: memref<16x1xf32, #tpu.memory_space<vmem>>, %arg6: memref<1x16xf32, #tpu.memory_space<vmem>>, %arg7: memref<1xf32, #tpu.memory_space<smem>>, %arg8: memref<1x128xf32, #tpu.memory_space<vmem>>) attributes {dimension_semantics = [#tpu.dimension_semantics<parallel>], iteration_bounds = array<i64: 1>, scalar_prefetch = 0 : i64, scratch_operands = 0 : i64, tpu.core_type = #tpu.core_type<tc>, window_params = [{transform_indices = @transform_0, window_bounds = array<i64: 8, 128>}, {pipeline_mode = #tpu.pipeline_mode<synchronous>, transform_indices = @transform_1, window_bounds = array<i64: 16, 8>}, {pipeline_mode = #tpu.pipeline_mode<synchronous>, transform_indices = @transform_2, window_bounds = array<i64: 16, 1>}, {pipeline_mode = #tpu.pipeline_mode<synchronous>, transform_indices = @transform_3, window_bounds = array<i64: 16, 16>}, {pipeline_mode = #tpu.pipeline_mode<synchronous>, transform_indices = @transform_4, window_bounds = array<i64: 16, 1>}, {pipeline_mode = #tpu.pipeline_mode<synchronous>, transform_indices = @transform_5, window_bounds = array<i64: 1, 16>}, {transform_indices = @transform_6, window_bounds = array<i64: 1>}, {transform_indices = @transform_7, window_bounds = array<i64: 1, 128>}]} {
    %c0 = arith.constant 0 : index
    %c0_0 = arith.constant 0 : index
    %0 = vector.load %arg1[%c0, %c0_0] : memref<8x128xf32, #tpu.memory_space<vmem>>, vector<8x128xf32>
    %c0_1 = arith.constant 0 : index
    %c0_2 = arith.constant 0 : index
    %1 = vector.load %arg2[%c0_1, %c0_2] : memref<16x8xf32, #tpu.memory_space<vmem>>, vector<16x8xf32>
    %cst = arith.constant dense<0.000000e+00> : vector<16x128xf32>
    %2 = tpu.matmul %1, %0, %cst {dimension_numbers = #tpu.dot_dimension_numbers<[1], [0], [0], [1], [0, 0, 1, 1], [], []>} : vector<16x8xf32>, vector<8x128xf32>, vector<16x128xf32> -> vector<16x128xf32>
    %c0_3 = arith.constant 0 : index
    %c0_4 = arith.constant 0 : index
    %3 = vector.load %arg3[%c0_3, %c0_4] : memref<16x1xf32, #tpu.memory_space<vmem>>, vector<16x1xf32>
    %4 = vector.broadcast %3 : vector<16x1xf32> to vector<16x128xf32>
    %5 = arith.addf %2, %4 : vector<16x128xf32>
    %cst_5 = arith.constant 0.000000e+00 : f32
    %6 = vector.broadcast %cst_5 : f32 to vector<16x128xf32>
    %7 = arith.maximumf %5, %6 : vector<16x128xf32>
    %c0_6 = arith.constant 0 : index
    %c0_7 = arith.constant 0 : index
    %8 = vector.load %arg4[%c0_6, %c0_7] : memref<16x16xf32, #tpu.memory_space<vmem>>, vector<16x16xf32>
    %cst_8 = arith.constant dense<0.000000e+00> : vector<16x128xf32>
    %9 = tpu.matmul %8, %7, %cst_8 {dimension_numbers = #tpu.dot_dimension_numbers<[1], [0], [0], [1], [0, 0, 1, 1], [], []>} : vector<16x16xf32>, vector<16x128xf32>, vector<16x128xf32> -> vector<16x128xf32>
    %c0_9 = arith.constant 0 : index
    %c0_10 = arith.constant 0 : index
    %10 = vector.load %arg5[%c0_9, %c0_10] : memref<16x1xf32, #tpu.memory_space<vmem>>, vector<16x1xf32>
    %11 = vector.broadcast %10 : vector<16x1xf32> to vector<16x128xf32>
    %12 = arith.addf %9, %11 : vector<16x128xf32>
    %cst_11 = arith.constant 0.000000e+00 : f32
    %13 = vector.broadcast %cst_11 : f32 to vector<16x128xf32>
    %14 = arith.maximumf %12, %13 : vector<16x128xf32>
    %c0_12 = arith.constant 0 : index
    %c0_13 = arith.constant 0 : index
    %15 = vector.load %arg6[%c0_12, %c0_13] : memref<1x16xf32, #tpu.memory_space<vmem>>, vector<1x16xf32>
    %cst_14 = arith.constant dense<0.000000e+00> : vector<1x128xf32>
    %16 = tpu.matmul %15, %14, %cst_14 {dimension_numbers = #tpu.dot_dimension_numbers<[1], [0], [0], [1], [0, 0, 1, 1], [], []>} : vector<1x16xf32>, vector<16x128xf32>, vector<1x128xf32> -> vector<1x128xf32>
    %c0_15 = arith.constant 0 : index
    %17 = memref.load %arg7[%c0_15] : memref<1xf32, #tpu.memory_space<smem>>
    %18 = vector.broadcast %17 : f32 to vector<1x128xf32>
    %19 = arith.addf %16, %18 : vector<1x128xf32>
    %c0_16 = arith.constant 0 : index
    %c0_17 = arith.constant 0 : index
    %20 = vector.load %arg8[%c0_16, %c0_17] : memref<1x128xf32, #tpu.memory_space<vmem>>, vector<1x128xf32>
    tpu.vector_store %arg8[%c0_16, %c0_17], %19 {strides = array<i32>} : memref<1x128xf32, #tpu.memory_space<vmem>>, vector<1x128xf32>,
    return
  }
  func.func @transform_0(%arg0: i32) -> (i32, i32) {
    %c0_i32 = arith.constant 0 : i32
    %c0_i32_0 = arith.constant 0 : i32
    return %c0_i32, %arg0 : i32, i32
  }
  func.func @transform_1(%arg0: i32) -> (i32, i32) {
    %c0_i32 = arith.constant 0 : i32
    %c0_i32_0 = arith.constant 0 : i32
    %c0_i32_1 = arith.constant 0 : i32
    return %c0_i32, %c0_i32_0 : i32, i32
  }
  func.func @transform_2(%arg0: i32) -> (i32, i32) {
    %c0_i32 = arith.constant 0 : i32
    %c0_i32_0 = arith.constant 0 : i32
    %c0_i32_1 = arith.constant 0 : i32
    return %c0_i32, %c0_i32_0 : i32, i32
  }
  func.func @transform_3(%arg0: i32) -> (i32, i32) {
    %c0_i32 = arith.constant 0 : i32
    %c0_i32_0 = arith.constant 0 : i32
    %c0_i32_1 = arith.constant 0 : i32
    return %c0_i32, %c0_i32_0 : i32, i32
  }
  func.func @transform_4(%arg0: i32) -> (i32, i32) {
    %c0_i32 = arith.constant 0 : i32
    %c0_i32_0 = arith.constant 0 : i32
    %c0_i32_1 = arith.constant 0 : i32
    return %c0_i32, %c0_i32_0 : i32, i32
  }
  func.func @transform_5(%arg0: i32) -> (i32, i32) {
    %c0_i32 = arith.constant 0 : i32
    %c0_i32_0 = arith.constant 0 : i32
    %c0_i32_1 = arith.constant 0 : i32
    return %c0_i32, %c0_i32_0 : i32, i32
  }
  func.func @transform_6(%arg0: i32) -> i32 {
    %c0_i32 = arith.constant 0 : i32
    %c0_i32_0 = arith.constant 0 : i32
    return %c0_i32 : i32
  }
  func.func @transform_7(%arg0: i32) -> (i32, i32) {
    %c0_i32 = arith.constant 0 : i32
    %c0_i32_0 = arith.constant 0 : i32
    return %c0_i32, %arg0 : i32, i32
  }
}

</mosaic_0001>

<bundles_post_ra>
// kernel: mergenet_forward.1
= control target key start
LH: loop header
LB: loop body
LE: loop exit
PB: predicated region body
PF: predicated region fallthrough
CT: control target
= control target key end

     0   :  { %vm43_vm0 = vcmask 64512   ;;  %s461_s0 = inlined_call_operand.vmem [shape: f32[8,128], index: 0, kind: input, shape index: {}]   ;;  %s462_s1 = inlined_call_operand.vmem [shape: f32[16,8], index: 1, kind: input, shape index: {}]   ;;  %s463_s2 = inlined_call_operand.vmem [shape: f32[16,1], index: 2, kind: input, shape index: {}]   ;;  %s464_s3 = inlined_call_operand.vmem [shape: f32[16,16], index: 3, kind: input, shape index: {}]   ;;  %s465_s4 = inlined_call_operand.vmem [shape: f32[16,1], index: 4, kind: input, shape index: {}]   ;;  %s466_s5 = inlined_call_operand.vmem [shape: f32[1,16], index: 5, kind: input, shape index: {}]   ;;  %s467_s6 = inlined_call_operand.<no memory space> [shape: f32[1], index: 6, kind: input, shape index: {}]   ;;  %s468_s7 = inlined_call_operand.hbm [shape: f32[1,128], index: 7, kind: output, shape index: {}]  }
   0x1   :  { %v28_v0 = vld [vmem:[%s461_s0] sm:$0xff]  ;;  %v30_v2 = vld [vmem:[%s462_s1 + $0x8] sm:$0xff] }
   0x2   :  { %v29_v1 = vld [vmem:[%s462_s1] sm:$0xff]  ;;  %331 = vmatprep.subr.mxu0 %v28_v0  ;;  %v32_v3 = vld [vmem:[%s463_s2 + $0x8] sm:$0xff] }
   0x3   :  { %333 = vmatprep.mubr.msk.f32.mxu0 %vm43_vm0, %v29_v1 }
   0x4   :  { %13 = vsyncpa [#allocation4], 0  ;;  %332 = vmatpush3.msra.mxu0 %v28_v0  ;;  %v378_v4 = vmov 0   ;;  %v31_v5 = vld [vmem:[%s463_s2] sm:$0xff]  ;;  %vm141_vm1 = vcmask 130048   ;;  %v130_v7 = vld [vmem:[%s465_s4 + $0x8] sm:$0xff]  ;;  %v227_v28 = vstv %s467_s6 }
   0x5   :  { %354 = vset.pattern.permute.xlu0 %v378_v4  ;;  %334 = vmatmul.mubr.msk.f32.vlgmr.msra.gmra.mxu0 %vm43_vm0, %v30_v2  ;;  %v127_v6 = vld [vmem:[%s464_s3] sm:$0xff]  ;;  %v128_v17 = vld [vmem:[%s464_s3 + $0x8] sm:$0xff]  ;;  %v379_v18 = vmov 0.0   ;;  %vm380_vm2 = vmmov 0   ;;  %s381_s18 = smov [#allocation3]  }
   0x6   :  { %40 = vperm.xlu0 %354, %v32_v3   ;;  %355 = vset.pattern.permute.xlu1 %v378_v4  ;;  %v129_v8 = vld [vmem:[%s465_s4] sm:$0xff]  ;;  %s308_s19 = sshll.u32 %s381_s18, 4  ;;  %s309_s19 = int_to_ptr.vmem [resolvable:$true] %s308_s19 }
   0x7   :  { %340 = vmatprep.mubr.msk.f32.mxu1 %vm141_vm1, %v127_v6  ;;  %138 = vperm.xlu1 %355, %v130_v7   ;;  %v225_v27 = vld [vmem:[%s466_s5] sm:$0x1]  ;;  %s356_s20 = scalar_lea.vmem %s309_s19, 16  ;;  %s360_s21 = scalar_lea.vmem %s309_s19, 32 }
   0x8   :  { %343 = vmatprep.subr.mxu0 %v379_v18  ;;  %347 = vmatprep.mubr.msk.f32.mxu0 %vm380_vm2, %v379_v18  ;;  %p357_p0 = scmp.ne.s32.totalorder %s309_s19, %s356_s20  ;;  %p361_p1 = scmp.lt.s32.totalorder %s309_s19, %s309_s19 }
   0x9   :  { %p362_p2 = scmp.lt.s32.totalorder %s360_s21, %s356_s20 }
   0xa   :  { %35 = vperm.xlu0 %354, %v31_v5  }
   0xb   :  { %133 = vperm.xlu1 %355, %v129_v8   ;;  %p363_p3 = por %p362_p2, %p361_p1 }
   0xd   :  { %p364_p4 = pnand %p363_p3, %p357_p0 }
  0x81   :  { %v41_v9 = vpop.permute.xlu0 %40 }
  0x82   :  { %v139_v19 = vpop.permute.xlu1 %138 }
  0x85   :  { %v36_v12 = vpop.permute.xlu0 %35 }
  0x86   :  { %v134_v22 = vpop.permute.xlu1 %133 }
  0xc5   :  { %v335_v10 = vpop.f32.mrf.mxu0 }
  0xc6   :  { %v122_v11 = vadd.f32 %v335_v10, %v41_v9 }
  0xc7   :  { %v116_v13 = vpop.f32.mrf.mxu0 }
  0xc8   :  { %v126_v14 = vmax.f32 %v122_v11, 0.0  ;;  %v117_v15 = vadd.f32 %v116_v13, %v36_v12 }
  0xca   :  { %v125_v16 = vmax.f32 %v117_v15, 0.0  ;;  %336 = vmatprep.subr.mxu1 %v126_v14 }
  0xcb   :  { %337 = vmatpush3.msra.mxu1 %v126_v14 }
  0xcc   :  { %338 = vmatprep.subr.mxu1 %v125_v16 }
  0xcd   :  { %339 = vmatpush3.msra.mxu1 %v125_v16 }
  0xce   :  { %341 = vmatmul.mubr.msk.f32.vlgmr.msra.gmra.mxu1 %vm141_vm1, %v128_v17 }
 0x18e   :  { %v342_v20 = vpop.f32.mrf.mxu1 }
 0x18f   :  { %v220_v21 = vadd.f32 %v342_v20, %v139_v19 }
 0x190   :  { %v214_v23 = vpop.f32.mrf.mxu1 }
 0x191   :  { %v224_v24 = vmax.f32 %v220_v21, 0.0  ;;  %v215_v25 = vadd.f32 %v214_v23, %v134_v22 }
 0x193   :  { %v223_v26 = vmax.f32 %v215_v25, 0.0  ;;  %344 = vmatpush3.msra.mxu0 %v224_v24 }
 0x194   :  { %345 = vmatprep.subr.mxu0 %v379_v18 }
 0x195   :  { %346 = vmatpush3.msra.mxu0 %v223_v26 }
 0x196   :  { %348 = vmatmul.mubr.msk.f32.vlgmr.msra.gmra.mxu0 %vm141_vm1, %v225_v27 }
 0x256   :  { %v297_v29 = vpop.f32.mrf.mxu0 }
 0x257   :  { %v298_v30 = vadd.f32 %v297_v29, %v227_v28 }
 0x258   :  { %v349_v31 = vpop.f32.mrf.mxu0 }
 0x259   :  { %301 = vst [vmem:[#allocation3] sm:$0x1] %v298_v30 }
 0x25a   :  { %367 = shalt.err (!%p364_p4)
}
 0x25b   :  { %311 = dma.vmem_to_hbm [thread:$0]  %s309_s19, 16, %s468_s7, [#allocation4]  }
 0x25c   :  { %376 = dma.done.wait [#allocation4], 16  }
 0x25d   :  { %377 = vsyncadd [#allocation4], 4294967280 }
 0x25e   :  { %315 = vsyncpa [#allocation4], 1 }

</bundles_post_ra>
